<compile_context>
chip_gen: v7x
topology: tpu7x:2x2x1
jax: 0.10.0
libtpu: 0.0.40
codegen_flags: <defaults>
</compile_context>

<pallas_src>
import functools

import jax
import jax.numpy as jnp
from jax.experimental import pallas as pl
from jax.experimental.pallas import tpu as pltpu

TILE_B = 512  # rows (lanes) per grid step; multiple of 128, >= 512 per review


def mlp_kernel(x_ref, w1_ref, b1_ref, w2_ref, b2_ref, w3_ref, b3_ref, o_ref):
    # x_ref: (2, TILE_B) feature-major tile; lane dim = batch (lane-dense).
    x = x_ref[...]
    w1 = w1_ref[...]          # (16, 2)  -- PyTorch (out, in) layout
    b1 = b1_ref[...]          # (16, 1)

    # ---- layer 1: in_features = 2 -> VPU broadcast-FMA, skip the MXU ----
    h1 = w1[:, 0:1] * x[0:1, :] + w1[:, 1:2] * x[1:2, :] + b1   # (16, TILE_B)
    h1 = jnp.maximum(h1, 0.0)

    # ---- layer 2: 16x16 contraction -> keep on the MXU ----
    h2 = jnp.dot(w2_ref[...], h1, preferred_element_type=jnp.float32) + b2_ref[...]
    h2 = jnp.maximum(h2, 0.0)                                   # (16, TILE_B)

    # ---- layer 3: out_features = 2 -> unrolled VPU broadcast-FMA ----
    w3 = w3_ref[...]          # (2, 16)
    out = w3[:, 0:1] * h2[0:1, :]
    for k in range(1, 16):    # static unroll; traced once
        out = out + w3[:, k:k + 1] * h2[k:k + 1, :]
    out = out + b3_ref[...]                                     # (2, TILE_B)

    o_ref[...] = out.astype(o_ref.dtype)


@functools.partial(jax.jit, static_argnames=("tile_b",))
def mlp_forward(x, params, *, tile_b=TILE_B):
    """x: (B, 2) f32 -> (B, 2) f32, matching the PyTorch MLP forward."""
    w1, b1, w2, b2, w3, b3 = params
    B = x.shape[0]
    n_tiles = pl.cdiv(B, tile_b)
    b_pad = n_tiles * tile_b

    # Wrapper-side layout plumbing: pad the batch and go feature-major so the
    # kernel sees a lane-dense (2, b_pad) slab.
    x_t = jnp.pad(x, ((0, b_pad - B), (0, 0))).T                # (2, b_pad)

    const = lambda i: (0, 0)        # weights/biases resident across grid steps
    batch = lambda i: (0, i)        # activation tiles stride along the lanes

    weight_bytes = 4 * (16 * 2 + 16 + 16 * 16 + 16 + 2 * 16 + 2)
    cost = pl.CostEstimate(
        flops=640 * b_pad,
        transcendentals=0,
        bytes_accessed=16 * b_pad + weight_bytes,   # x in + out, both f32
    )

    out_t = pl.pallas_call(
        mlp_kernel,
        out_shape=jax.ShapeDtypeStruct((2, b_pad), jnp.float32),
        grid=(n_tiles,),
        in_specs=[
            pl.BlockSpec((2, tile_b), batch),    # x tile (lane = batch)
            pl.BlockSpec((16, 2), const),        # w1
            pl.BlockSpec((16, 1), const),        # b1
            pl.BlockSpec((16, 16), const),       # w2
            pl.BlockSpec((16, 1), const),        # b2
            pl.BlockSpec((2, 16), const),        # w3
            pl.BlockSpec((2, 1), const),         # b3
        ],
        out_specs=pl.BlockSpec((2, tile_b), batch),
        compiler_params=pltpu.CompilerParams(
            dimension_semantics=("parallel",),   # independent batch tiles
        ),
        cost_estimate=cost,
    )(x_t, w1, b1, w2, b2, w3, b3)

    # Back to the PyTorch-facing (B, 2) layout.
    return out_t[:, :B].T


def xavier_uniform(key, fan_out, fan_in):
    # Matches torch.nn.init.xavier_uniform_ (gain=1); stored as (out, in).
    bound = jnp.sqrt(6.0 / (fan_in + fan_out))
    return jax.random.uniform(
        key, (fan_out, fan_in), dtype=jnp.float32, minval=-bound, maxval=bound
    )


def init_params(key):
    k1, k2, k3 = jax.random.split(key, 3)
    w1 = xavier_uniform(k1, 16, 2)
    b1 = jnp.zeros((16, 1), jnp.float32)
    w2 = xavier_uniform(k2, 16, 16)
    b2 = jnp.zeros((16, 1), jnp.float32)
    w3 = xavier_uniform(k3, 2, 16)
    b3 = jnp.zeros((2, 1), jnp.float32)
    return (w1, b1, w2, b2, w3, b3)


if __name__ == "__main__":
    key = jax.random.PRNGKey(0)
    pkey, xkey = jax.random.split(key)

    params = init_params(pkey)
    x = jax.random.normal(xkey, (8, 2), dtype=jnp.float32)   # batch=8, in=2

    out = jax.block_until_ready(mlp_forward(x, params))

    # Plain-JAX reference of the same math (PyTorch semantics: y = x W^T + b).
    w1, b1, w2, b2, w3, b3 = params
    ref = jnp.maximum(x @ w1.T + b1.T, 0.0)
    ref = jnp.maximum(ref @ w2.T + b2.T, 0.0)
    ref = ref @ w3.T + b3.T

    assert out.shape == (8, 2)
    assert jnp.allclose(out, ref, atol=1e-4, rtol=1e-4)

    print("KERNEL_OK")
</pallas_src>

<mosaic_0001>
module attributes {stable_mosaic.version = 11 : i64} {
  func.func @mlp_kernel(%arg0: i32, %arg1: memref<2x512xf32, #tpu.memory_space<vmem>>, %arg2: memref<16x2xf32, #tpu.memory_space<vmem>>, %arg3: memref<16x1xf32, #tpu.memory_space<vmem>>, %arg4: memref<16x16xf32, #tpu.memory_space<vmem>>, %arg5: memref<16x1xf32, #tpu.memory_space<vmem>>, %arg6: memref<2x16xf32, #tpu.memory_space<vmem>>, %arg7: memref<2x1xf32, #tpu.memory_space<vmem>>, %arg8: memref<2x512xf32, #tpu.memory_space<vmem>>) attributes {dimension_semantics = [#tpu.dimension_semantics<parallel>], iteration_bounds = array<i64: 1>, scalar_prefetch = 0 : i64, scratch_operands = 0 : i64, tpu.core_type = #tpu.core_type<tc>, window_params = [{transform_indices = @transform_0, window_bounds = array<i64: 2, 512>}, {pipeline_mode = #tpu.pipeline_mode<synchronous>, transform_indices = @transform_1, window_bounds = array<i64: 16, 2>}, {pipeline_mode = #tpu.pipeline_mode<synchronous>, transform_indices = @transform_2, window_bounds = array<i64: 16, 1>}, {pipeline_mode = #tpu.pipeline_mode<synchronous>, transform_indices = @transform_3, window_bounds = array<i64: 16, 16>}, {pipeline_mode = #tpu.pipeline_mode<synchronous>, transform_indices = @transform_4, window_bounds = array<i64: 16, 1>}, {pipeline_mode = #tpu.pipeline_mode<synchronous>, transform_indices = @transform_5, window_bounds = array<i64: 2, 16>}, {pipeline_mode = #tpu.pipeline_mode<synchronous>, transform_indices = @transform_6, window_bounds = array<i64: 2, 1>}, {transform_indices = @transform_7, window_bounds = array<i64: 2, 512>}]} {
    %c0 = arith.constant 0 : index
    %c0_0 = arith.constant 0 : index
    %0 = vector.load %arg1[%c0, %c0_0] : memref<2x512xf32, #tpu.memory_space<vmem>>, vector<2x512xf32>
    %c0_1 = arith.constant 0 : index
    %c0_2 = arith.constant 0 : index
    %1 = vector.load %arg2[%c0_1, %c0_2] : memref<16x2xf32, #tpu.memory_space<vmem>>, vector<16x2xf32>
    %c0_3 = arith.constant 0 : index
    %c0_4 = arith.constant 0 : index
    %2 = vector.load %arg3[%c0_3, %c0_4] : memref<16x1xf32, #tpu.memory_space<vmem>>, vector<16x1xf32>
    %3 = vector.extract_strided_slice %1 {offsets = [0, 0], sizes = [16, 1], strides = [1, 1]} : vector<16x2xf32> to vector<16x1xf32>
    %4 = vector.extract_strided_slice %0 {offsets = [0, 0], sizes = [1, 512], strides = [1, 1]} : vector<2x512xf32> to vector<1x512xf32>
    %5 = vector.broadcast %3 : vector<16x1xf32> to vector<16x512xf32>
    %6 = vector.broadcast %4 : vector<1x512xf32> to vector<16x512xf32>
    %7 = arith.mulf %5, %6 : vector<16x512xf32>
    %8 = vector.extract_strided_slice %1 {offsets = [0, 1], sizes = [16, 1], strides = [1, 1]} : vector<16x2xf32> to vector<16x1xf32>
    %9 = vector.extract_strided_slice %0 {offsets = [1, 0], sizes = [1, 512], strides = [1, 1]} : vector<2x512xf32> to vector<1x512xf32>
    %10 = vector.broadcast %8 : vector<16x1xf32> to vector<16x512xf32>
    %11 = vector.broadcast %9 : vector<1x512xf32> to vector<16x512xf32>
    %12 = arith.mulf %10, %11 : vector<16x512xf32>
    %13 = arith.addf %7, %12 : vector<16x512xf32>
    %14 = vector.broadcast %2 : vector<16x1xf32> to vector<16x512xf32>
    %15 = arith.addf %13, %14 : vector<16x512xf32>
    %cst = arith.constant 0.000000e+00 : f32
    %16 = vector.broadcast %cst : f32 to vector<16x512xf32>
    %17 = arith.maximumf %15, %16 : vector<16x512xf32>
    %c0_5 = arith.constant 0 : index
    %c0_6 = arith.constant 0 : index
    %18 = vector.load %arg4[%c0_5, %c0_6] : memref<16x16xf32, #tpu.memory_space<vmem>>, vector<16x16xf32>
    %cst_7 = arith.constant dense<0.000000e+00> : vector<16x512xf32>
    %19 = tpu.matmul %18, %17, %cst_7 {dimension_numbers = #tpu.dot_dimension_numbers<[1], [0], [0], [1], [0, 0, 1, 1], [], []>} : vector<16x16xf32>, vector<16x512xf32>, vector<16x512xf32> -> vector<16x512xf32>
    %c0_8 = arith.constant 0 : index
    %c0_9 = arith.constant 0 : index
    %20 = vector.load %arg5[%c0_8, %c0_9] : memref<16x1xf32, #tpu.memory_space<vmem>>, vector<16x1xf32>
    %21 = vector.broadcast %20 : vector<16x1xf32> to vector<16x512xf32>
    %22 = arith.addf %19, %21 : vector<16x512xf32>
    %cst_10 = arith.constant 0.000000e+00 : f32
    %23 = vector.broadcast %cst_10 : f32 to vector<16x512xf32>
    %24 = arith.maximumf %22, %23 : vector<16x512xf32>
    %c0_11 = arith.constant 0 : index
    %c0_12 = arith.constant 0 : index
    %25 = vector.load %arg6[%c0_11, %c0_12] : memref<2x16xf32, #tpu.memory_space<vmem>>, vector<2x16xf32>
    %26 = vector.extract_strided_slice %25 {offsets = [0, 0], sizes = [2, 1], strides = [1, 1]} : vector<2x16xf32> to vector<2x1xf32>
    %27 = vector.extract_strided_slice %24 {offsets = [0, 0], sizes = [1, 512], strides = [1, 1]} : vector<16x512xf32> to vector<1x512xf32>
    %28 = vector.broadcast %26 : vector<2x1xf32> to vector<2x512xf32>
    %29 = vector.broadcast %27 : vector<1x512xf32> to vector<2x512xf32>
    %30 = arith.mulf %28, %29 : vector<2x512xf32>
    %31 = vector.extract_strided_slice %25 {offsets = [0, 1], sizes = [2, 1], strides = [1, 1]} : vector<2x16xf32> to vector<2x1xf32>
    %32 = vector.extract_strided_slice %24 {offsets = [1, 0], sizes = [1, 512], strides = [1, 1]} : vector<16x512xf32> to vector<1x512xf32>
    %33 = vector.broadcast %31 : vector<2x1xf32> to vector<2x512xf32>
    %34 = vector.broadcast %32 : vector<1x512xf32> to vector<2x512xf32>
    %35 = arith.mulf %33, %34 : vector<2x512xf32>
    %36 = arith.addf %30, %35 : vector<2x512xf32>
    %37 = vector.extract_strided_slice %25 {offsets = [0, 2], sizes = [2, 1], strides = [1, 1]} : vector<2x16xf32> to vector<2x1xf32>
    %38 = vector.extract_strided_slice %24 {offsets = [2, 0], sizes = [1, 512], strides = [1, 1]} : vector<16x512xf32> to vector<1x512xf32>
    %39 = vector.broadcast %37 : vector<2x1xf32> to vector<2x512xf32>
    %40 = vector.broadcast %38 : vector<1x512xf32> to vector<2x512xf32>
    %41 = arith.mulf %39, %40 : vector<2x512xf32>
    %42 = arith.addf %36, %41 : vector<2x512xf32>
    %43 = vector.extract_strided_slice %25 {offsets = [0, 3], sizes = [2, 1], strides = [1, 1]} : vector<2x16xf32> to vector<2x1xf32>
    %44 = vector.extract_strided_slice %24 {offsets = [3, 0], sizes = [1, 512], strides = [1, 1]} : vector<16x512xf32> to vector<1x512xf32>
    %45 = vector.broadcast %43 : vector<2x1xf32> to vector<2x512xf32>
    %46 = vector.broadcast %44 : vector<1x512xf32> to vector<2x512xf32>
    %47 = arith.mulf %45, %46 : vector<2x512xf32>
    %48 = arith.addf %42, %47 : vector<2x512xf32>
    %49 = vector.extract_strided_slice %25 {offsets = [0, 4], sizes = [2, 1], strides = [1, 1]} : vector<2x16xf32> to vector<2x1xf32>
    %50 = vector.extract_strided_slice %24 {offsets = [4, 0], sizes = [1, 512], strides = [1, 1]} : vector<16x512xf32> to vector<1x512xf32>
    %51 = vector.broadcast %49 : vector<2x1xf32> to vector<2x512xf32>
    %52 = vector.broadcast %50 : vector<1x512xf32> to vector<2x512xf32>
    %53 = arith.mulf %51, %52 : vector<2x512xf32>
    %54 = arith.addf %48, %53 : vector<2x512xf32>
    %55 = vector.extract_strided_slice %25 {offsets = [0, 5], sizes = [2, 1], strides = [1, 1]} : vector<2x16xf32> to vector<2x1xf32>
    %56 = vector.extract_strided_slice %24 {offsets = [5, 0], sizes = [1, 512], strides = [1, 1]} : vector<16x512xf32> to vector<1x512xf32>
    %57 = vector.broadcast %55 : vector<2x1xf32> to vector<2x512xf32>
    %58 = vector.broadcast %56 : vector<1x512xf32> to vector<2x512xf32>
    %59 = arith.mulf %57, %58 : vector<2x512xf32>
    %60 = arith.addf %54, %59 : vector<2x512xf32>
    %61 = vector.extract_strided_slice %25 {offsets = [0, 6], sizes = [2, 1], strides = [1, 1]} : vector<2x16xf32> to vector<2x1xf32>
    %62 = vector.extract_strided_slice %24 {offsets = [6, 0], sizes = [1, 512], strides = [1, 1]} : vector<16x512xf32> to vector<1x512xf32>
    %63 = vector.broadcast %61 : vector<2x1xf32> to vector<2x512xf32>
    %64 = vector.broadcast %62 : vector<1x512xf32> to vector<2x512xf32>
    %65 = arith.mulf %63, %64 : vector<2x512xf32>
    %66 = arith.addf %60, %65 : vector<2x512xf32>
    %67 = vector.extract_strided_slice %25 {offsets = [0, 7], sizes = [2, 1], strides = [1, 1]} : vector<2x16xf32> to vector<2x1xf32>
    %68 = vector.extract_strided_slice %24 {offsets = [7, 0], sizes = [1, 512], strides = [1, 1]} : vector<16x512xf32> to vector<1x512xf32>
    %69 = vector.broadcast %67 : vector<2x1xf32> to vector<2x512xf32>
    %70 = vector.broadcast %68 : vector<1x512xf32> to vector<2x512xf32>
    %71 = arith.mulf %69, %70 : vector<2x512xf32>
    %72 = arith.addf %66, %71 : vector<2x512xf32>
    %73 = vector.extract_strided_slice %25 {offsets = [0, 8], sizes = [2, 1], strides = [1, 1]} : vector<2x16xf32> to vector<2x1xf32>
    %74 = vector.extract_strided_slice %24 {offsets = [8, 0], sizes = [1, 512], strides = [1, 1]} : vector<16x512xf32> to vector<1x512xf32>
    %75 = vector.broadcast %73 : vector<2x1xf32> to vector<2x512xf32>
    %76 = vector.broadcast %74 : vector<1x512xf32> to vector<2x512xf32>
    %77 = arith.mulf %75, %76 : vector<2x512xf32>
    %78 = arith.addf %72, %77 : vector<2x512xf32>
    %79 = vector.extract_strided_slice %25 {offsets = [0, 9], sizes = [2, 1], strides = [1, 1]} : vector<2x16xf32> to vector<2x1xf32>
    %80 = vector.extract_strided_slice %24 {offsets = [9, 0], sizes = [1, 512], strides = [1, 1]} : vector<16x512xf32> to vector<1x512xf32>
    %81 = vector.broadcast %79 : vector<2x1xf32> to vector<2x512xf32>
    %82 = vector.broadcast %80 : vector<1x512xf32> to vector<2x512xf32>
    %83 = arith.mulf %81, %82 : vector<2x512xf32>
    %84 = arith.addf %78, %83 : vector<2x512xf32>
    %85 = vector.extract_strided_slice %25 {offsets = [0, 10], sizes = [2, 1], strides = [1, 1]} : vector<2x16xf32> to vector<2x1xf32>
    %86 = vector.extract_strided_slice %24 {offsets = [10, 0], sizes = [1, 512], strides = [1, 1]} : vector<16x512xf32> to vector<1x512xf32>
    %87 = vector.broadcast %85 : vector<2x1xf32> to vector<2x512xf32>
    %88 = vector.broadcast %86 : vector<1x512xf32> to vector<2x512xf32>
    %89 = arith.mulf %87, %88 : vector<2x512xf32>
    %90 = arith.addf %84, %89 : vector<2x512xf32>
    %91 = vector.extract_strided_slice %25 {offsets = [0, 11], sizes = [2, 1], strides = [1, 1]} : vector<2x16xf32> to vector<2x1xf32>
    %92 = vector.extract_strided_slice %24 {offsets = [11, 0], sizes = [1, 512], strides = [1, 1]} : vector<16x512xf32> to vector<1x512xf32>
    %93 = vector.broadcast %91 : vector<2x1xf32> to vector<2x512xf32>
    %94 = vector.broadcast %92 : vector<1x512xf32> to vector<2x512xf32>
    %95 = arith.mulf %93, %94 : vector<2x512xf32>
    %96 = arith.addf %90, %95 : vector<2x512xf32>
    %97 = vector.extract_strided_slice %25 {offsets = [0, 12], sizes = [2, 1], strides = [1, 1]} : vector<2x16xf32> to vector<2x1xf32>
    %98 = vector.extract_strided_slice %24 {offsets = [12, 0], sizes = [1, 512], strides = [1, 1]} : vector<16x512xf32> to vector<1x512xf32>
    %99 = vector.broadcast %97 : vector<2x1xf32> to vector<2x512xf32>
    %100 = vector.broadcast %98 : vector<1x512xf32> to vector<2x512xf32>
    %101 = arith.mulf %99, %100 : vector<2x512xf32>
    %102 = arith.addf %96, %101 : vector<2x512xf32>
    %103 = vector.extract_strided_slice %25 {offsets = [0, 13], sizes = [2, 1], strides = [1, 1]} : vector<2x16xf32> to vector<2x1xf32>
    %104 = vector.extract_strided_slice %24 {offsets = [13, 0], sizes = [1, 512], strides = [1, 1]} : vector<16x512xf32> to vector<1x512xf32>
    %105 = vector.broadcast %103 : vector<2x1xf32> to vector<2x512xf32>
    %106 = vector.broadcast %104 : vector<1x512xf32> to vector<2x512xf32>
    %107 = arith.mulf %105, %106 : vector<2x512xf32>
    %108 = arith.addf %102, %107 : vector<2x512xf32>
    %109 = vector.extract_strided_slice %25 {offsets = [0, 14], sizes = [2, 1], strides = [1, 1]} : vector<2x16xf32> to vector<2x1xf32>
    %110 = vector.extract_strided_slice %24 {offsets = [14, 0], sizes = [1, 512], strides = [1, 1]} : vector<16x512xf32> to vector<1x512xf32>
    %111 = vector.broadcast %109 : vector<2x1xf32> to vector<2x512xf32>
    %112 = vector.broadcast %110 : vector<1x512xf32> to vector<2x512xf32>
    %113 = arith.mulf %111, %112 : vector<2x512xf32>
    %114 = arith.addf %108, %113 : vector<2x512xf32>
    %115 = vector.extract_strided_slice %25 {offsets = [0, 15], sizes = [2, 1], strides = [1, 1]} : vector<2x16xf32> to vector<2x1xf32>
    %116 = vector.extract_strided_slice %24 {offsets = [15, 0], sizes = [1, 512], strides = [1, 1]} : vector<16x512xf32> to vector<1x512xf32>
    %117 = vector.broadcast %115 : vector<2x1xf32> to vector<2x512xf32>
    %118 = vector.broadcast %116 : vector<1x512xf32> to vector<2x512xf32>
    %119 = arith.mulf %117, %118 : vector<2x512xf32>
    %120 = arith.addf %114, %119 : vector<2x512xf32>
    %c0_13 = arith.constant 0 : index
    %c0_14 = arith.constant 0 : index
    %121 = vector.load %arg7[%c0_13, %c0_14] : memref<2x1xf32, #tpu.memory_space<vmem>>, vector<2x1xf32>
    %122 = vector.broadcast %121 : vector<2x1xf32> to vector<2x512xf32>
    %123 = arith.addf %120, %122 : vector<2x512xf32>
    %c0_15 = arith.constant 0 : index
    %c0_16 = arith.constant 0 : index
    %124 = vector.load %arg8[%c0_15, %c0_16] : memref<2x512xf32, #tpu.memory_space<vmem>>, vector<2x512xf32>
    tpu.vector_store %arg8[%c0_15, %c0_16], %123 {strides = array<i32>} : memref<2x512xf32, #tpu.memory_space<vmem>>, vector<2x512xf32>,
    return
  }
  func.func @transform_0(%arg0: i32) -> (i32, i32) {
    %c0_i32 = arith.constant 0 : i32
    %c0_i32_0 = arith.constant 0 : i32
    return %c0_i32, %arg0 : i32, i32
  }
  func.func @transform_1(%arg0: i32) -> (i32, i32) {
    %c0_i32 = arith.constant 0 : i32
    %c0_i32_0 = arith.constant 0 : i32
    %c0_i32_1 = arith.constant 0 : i32
    return %c0_i32, %c0_i32_0 : i32, i32
  }
  func.func @transform_2(%arg0: i32) -> (i32, i32) {
    %c0_i32 = arith.constant 0 : i32
    %c0_i32_0 = arith.constant 0 : i32
    %c0_i32_1 = arith.constant 0 : i32
    return %c0_i32, %c0_i32_0 : i32, i32
  }
  func.func @transform_3(%arg0: i32) -> (i32, i32) {
    %c0_i32 = arith.constant 0 : i32
    %c0_i32_0 = arith.constant 0 : i32
    %c0_i32_1 = arith.constant 0 : i32
    return %c0_i32, %c0_i32_0 : i32, i32
  }
  func.func @transform_4(%arg0: i32) -> (i32, i32) {
    %c0_i32 = arith.constant 0 : i32
    %c0_i32_0 = arith.constant 0 : i32
    %c0_i32_1 = arith.constant 0 : i32
    return %c0_i32, %c0_i32_0 : i32, i32
  }
  func.func @transform_5(%arg0: i32) -> (i32, i32) {
    %c0_i32 = arith.constant 0 : i32
    %c0_i32_0 = arith.constant 0 : i32
    %c0_i32_1 = arith.constant 0 : i32
    return %c0_i32, %c0_i32_0 : i32, i32
  }
  func.func @transform_6(%arg0: i32) -> (i32, i32) {
    %c0_i32 = arith.constant 0 : i32
    %c0_i32_0 = arith.constant 0 : i32
    %c0_i32_1 = arith.constant 0 : i32
    return %c0_i32, %c0_i32_0 : i32, i32
  }
  func.func @transform_7(%arg0: i32) -> (i32, i32) {
    %c0_i32 = arith.constant 0 : i32
    %c0_i32_0 = arith.constant 0 : i32
    return %c0_i32, %arg0 : i32, i32
  }
}

</mosaic_0001>

<bundles_post_ra>
// kernel: mlp_forward.1
= control target key start
LH: loop header
LB: loop body
LE: loop exit
PB: predicated region body
PF: predicated region fallthrough
CT: control target
= control target key end

     0   :  { %v889_v0 = vmov 1   ;;  %v890_v1 = vmov 0   ;;  %v891_v8 = vmov 0.0   ;;  %v892_v9 = vmov 2   ;;  %s1238_s1 = inlined_call_operand.vmem [shape: f32[16,2], index: 1, kind: input, shape index: {}]   ;;  %s1239_s2 = inlined_call_operand.vmem [shape: f32[16,1], index: 2, kind: input, shape index: {}]   ;;  %s1240_s4 = inlined_call_operand.vmem [shape: f32[16,1], index: 4, kind: input, shape index: {}]   ;;  %s1241_s5 = inlined_call_operand.vmem [shape: f32[2,16], index: 5, kind: input, shape index: {}]   ;;  %s1242_s6 = inlined_call_operand.vmem [shape: f32[2,1], index: 6, kind: input, shape index: {}]   ;;  %s1243_s0 = inlined_call_operand.vmem [shape: f32[2,512], index: 0, kind: input, shape index: {}]   ;;  %s1244_s3 = inlined_call_operand.vmem [shape: f32[16,16], index: 3, kind: input, shape index: {}]   ;;  %s1245_s7 = inlined_call_operand.vmem [shape: f32[2,512], index: 7, kind: output, shape index: {}]  }
   0x1   :  { %869 = vset.pattern.permute.xlu1 %v889_v0  ;;  %868 = vset.pattern.permute.xlu0 %v890_v1  ;;  %v27_v2 = vld [vmem:[%s1238_s1] sm:$0xff]  ;;  %v28_v3 = vld [vmem:[%s1238_s1 + $0x8] sm:$0xff]  ;;  %v893_v10 = vmov 4   ;;  %v894_v11 = vmov 3   ;;  %v895_v12 = vmov 6   ;;  %v896_v14 = vmov 9  }
   0x2   :  { %87 = vperm.xlu1 %869, %v27_v2   ;;  %33 = vperm.xlu0 %868, %v27_v2   ;;  %v29_v4 = vld [vmem:[%s1239_s2] sm:$0xff]  ;;  %v30_v5 = vld [vmem:[%s1239_s2 + $0x8] sm:$0xff]  ;;  %v897_v15 = vmov 5   ;;  %v898_v16 = vmov 12   ;;  %v899_v17 = vmov 7   ;;  %v900_v18 = vmov 15  }
   0x3   :  { %v174_v6 = vld [vmem:[%s1240_s4] sm:$0xff]  ;;  %257 = vmatprep.mubr.f32.mxu0 %v891_v8  ;;  %334 = vmatprep.mubr.f32.mxu1 %v891_v8  ;;  %v175_v13 = vld [vmem:[%s1240_s4 + $0x8] sm:$0xff]  ;;  %v901_v19 = vmov 8   ;;  %v902_v20 = vmov 10   ;;  %v903_v21 = vmov 11   ;;  %v904_v22 = vmov 13  }
   0x4   :  { %v355_v7 = vld [vmem:[%s1241_s5] sm:$0x3]  ;;  %v905_v23 = vmov 14   ;;  %v42_v25 = vlaneseq  ;;  %vm186_vm0 = vcmask 130048  }
   0x5   :  { %v801_v24 = vld [vmem:[%s1242_s6] sm:$0x3] }
   0x6   :  { %91 = vperm.xlu1 %869, %v28_v3   ;;  %38 = vperm.xlu0 %868, %v28_v3   ;;  %v978_v26 = vshrl.u32 %v42_v25, 7  ;;  %v26_v31 = vld [vmem:[%s1243_s0] sm:$0xff] }
   0x8   :  { %v981_v27 = vsub.s32 1, %v978_v26  ;;  %v984_v28 = vsub.s32 3, %v978_v26  ;;  %v987_v29 = vsub.s32 5, %v978_v26  ;;  %v990_v30 = vsub.s32 7, %v978_v26 }
   0x9   :  { %v996_v32 = vsub.s32 0, %v978_v26  ;;  %v999_v33 = vsub.s32 2, %v978_v26  ;;  %v1002_v34 = vsub.s32 4, %v978_v26  ;;  %v1005_v35 = vsub.s32 6, %v978_v26 }
   0xa   :  { %870 = vset.pattern.permute.xlu1 %v890_v1  ;;  %148 = vperm.xlu0 %868, %v29_v4   ;;  %v97_v36 = vrot.slane %v26_v31, %v981_v27  ;;  %v101_v37 = vrot.slane %v26_v31, %v984_v28  ;;  %v105_v38 = vrot.slane %v26_v31, %v987_v29 }
   0xb   :  { %153 = vperm.xlu1 %870, %v30_v5   ;;  %v109_v39 = vrot.slane %v26_v31, %v990_v30  ;;  %v45_v40 = vrot.slane %v26_v31, %v996_v32  ;;  %v49_v41 = vrot.slane %v26_v31, %v999_v33  ;;  %v53_v42 = vrot.slane %v26_v31, %v1002_v34 }
   0xc   :  { %v57_v43 = vrot.slane %v26_v31, %v1005_v35  ;;  %v117_v44 = vrot.slane %v97_v36, %v981_v27  ;;  %v121_v45 = vrot.slane %v101_v37, %v981_v27  ;;  %v125_v46 = vrot.slane %v105_v38, %v981_v27 }
   0xd   :  { %v129_v47 = vrot.slane %v109_v39, %v981_v27  ;;  %v65_v48 = vrot.slane %v45_v40, %v996_v32  ;;  %v69_v49 = vrot.slane %v49_v41, %v996_v32  ;;  %v73_v50 = vrot.slane %v53_v42, %v996_v32 }
   0xe   :  { %178 = vperm.xlu0 %868, %v174_v6   ;;  %v77_v51 = vrot.slane %v57_v43, %v996_v32 }
   0xf   :  { %358 = vperm.xlu1 %870, %v355_v7  }
  0x12   :  { %871 = vset.pattern.permute.xlu0 %v889_v0 }
  0x13   :  { %382 = vperm.xlu0 %871, %v355_v7   ;;  %872 = vset.pattern.permute.xlu1 %v892_v9 }
  0x14   :  { %410 = vperm.xlu1 %872, %v355_v7  }
  0x17   :  { %874 = vset.pattern.permute.xlu0 %v893_v10 }
  0x18   :  { %466 = vperm.xlu0 %874, %v355_v7   ;;  %873 = vset.pattern.permute.xlu1 %v894_v11 }
  0x19   :  { %438 = vperm.xlu1 %873, %v355_v7  }
  0x1c   :  { %877 = vset.pattern.permute.xlu0 %v895_v12 }
  0x1d   :  { %522 = vperm.xlu0 %877, %v355_v7   ;;  %875 = vset.pattern.permute.xlu1 %v890_v1 }
  0x1e   :  { %183 = vperm.xlu1 %875, %v175_v13  }
  0x21   :  { %880 = vset.pattern.permute.xlu0 %v896_v14 }
  0x22   :  { %606 = vperm.xlu0 %880, %v355_v7   ;;  %876 = vset.pattern.permute.xlu1 %v897_v15 }
  0x23   :  { %494 = vperm.xlu1 %876, %v355_v7  }
  0x26   :  { %883 = vset.pattern.permute.xlu0 %v898_v16 }
  0x27   :  { %690 = vperm.xlu0 %883, %v355_v7   ;;  %878 = vset.pattern.permute.xlu1 %v899_v17 }
  0x28   :  { %550 = vperm.xlu1 %878, %v355_v7  }
  0x2b   :  { %886 = vset.pattern.permute.xlu0 %v900_v18 }
  0x2c   :  { %774 = vperm.xlu0 %886, %v355_v7   ;;  %879 = vset.pattern.permute.xlu1 %v901_v19 }
  0x2d   :  { %578 = vperm.xlu1 %879, %v355_v7  }
  0x30   :  { %888 = vset.pattern.permute.xlu0 %v890_v1 }
  0x31   :  { %881 = vset.pattern.permute.xlu1 %v902_v20 }
  0x32   :  { %634 = vperm.xlu1 %881, %v355_v7  }
  0x36   :  { %882 = vset.pattern.permute.xlu1 %v903_v21 }
  0x37   :  { %662 = vperm.xlu1 %882, %v355_v7  }
  0x3b   :  { %884 = vset.pattern.permute.xlu1 %v904_v22 }
  0x3c   :  { %718 = vperm.xlu1 %884, %v355_v7  }
  0x40   :  { %885 = vset.pattern.permute.xlu1 %v905_v23 }
  0x41   :  { %746 = vperm.xlu1 %885, %v355_v7  }
  0x45   :  { %887 = vset.pattern.permute.xlu1 %v890_v1 }
  0x46   :  { %804 = vperm.xlu1 %887, %v801_v24  }
  0x81   :  { %v88_v52 = vpop.permute.xlu1 %87  ;;  %v34_v53 = vpop.permute.xlu0 %33 }
  0x82   :  { %v130_v54 = vmul.f32 %v117_v44, %v88_v52  ;;  %v131_v55 = vmul.f32 %v121_v45, %v88_v52  ;;  %v132_v56 = vmul.f32 %v125_v46, %v88_v52  ;;  %v133_v57 = vmul.f32 %v129_v47, %v88_v52 }
  0x83   :  { %v78_v58 = vmul.f32 %v65_v48, %v34_v53  ;;  %v79_v59 = vmul.f32 %v69_v49, %v34_v53  ;;  %v80_v60 = vmul.f32 %v73_v50, %v34_v53  ;;  %v81_v61 = vmul.f32 %v77_v51, %v34_v53 }
  0x85   :  { %v92_v62 = vpop.permute.xlu1 %91  ;;  %v39_v63 = vpop.permute.xlu0 %38  ;;  %v139_v9 = vadd.f32 %v131_v55, %v79_v59  ;;  %v141_v10 = vadd.f32 %v133_v57, %v81_v61  ;;  %v138_v11 = vadd.f32 %v130_v54, %v78_v58  ;;  %v140_v12 = vadd.f32 %v132_v56, %v80_v60 }
  0x86   :  { %v134_v0 = vmul.f32 %v117_v44, %v92_v62  ;;  %v135_v1 = vmul.f32 %v121_v45, %v92_v62  ;;  %v136_v2 = vmul.f32 %v125_v46, %v92_v62  ;;  %v137_v3 = vmul.f32 %v129_v47, %v92_v62 }
  0x87   :  { %v82_v4 = vmul.f32 %v65_v48, %v39_v63  ;;  %v83_v5 = vmul.f32 %v69_v49, %v39_v63  ;;  %v84_v6 = vmul.f32 %v73_v50, %v39_v63  ;;  %v85_v7 = vmul.f32 %v77_v51, %v39_v63  ;;  %v172_v48 = vld [vmem:[%s1244_s3] sm:$0xff]  ;;  %v173_v49 = vld [vmem:[%s1244_s3 + $0x8] sm:$0xff] }
  0x88   :  { %v906_v60 = vmov 1983009808  }
  0x89   :  { %v149_v13 = vpop.permute.xlu0 %148  ;;  %v143_v14 = vadd.f32 %v135_v1, %v83_v5  ;;  %v145_v15 = vadd.f32 %v137_v3, %v85_v7  ;;  %v142_v16 = vadd.f32 %v134_v0, %v82_v4  ;;  %v144_v17 = vadd.f32 %v136_v2, %v84_v6 }
  0x8a   :  { %v154_v18 = vpop.permute.xlu1 %153  ;;  %v157_v19 = vadd.f32 %v149_v13, %v139_v9  ;;  %v159_v20 = vadd.f32 %v149_v13, %v141_v10  ;;  %v156_v21 = vadd.f32 %v149_v13, %v138_v11  ;;  %v158_v22 = vadd.f32 %v149_v13, %v140_v12 }
  0x8b   :  { %v161_v23 = vadd.f32 %v154_v18, %v143_v14  ;;  %v163_v24 = vadd.f32 %v154_v18, %v145_v15  ;;  %v160_v25 = vadd.f32 %v154_v18, %v142_v16  ;;  %v162_v31 = vadd.f32 %v154_v18, %v144_v17 }
  0x8c   :  { %v165_v36 = vmax.f32 %v157_v19, 0.0  ;;  %v167_v37 = vmax.f32 %v159_v20, 0.0  ;;  %v164_v38 = vmax.f32 %v156_v21, 0.0  ;;  %v166_v39 = vmax.f32 %v158_v22, 0.0 }
  0x8d   :  { %v169_v40 = vmax.f32 %v161_v23, 0.0  ;;  %v171_v41 = vmax.f32 %v163_v24, 0.0  ;;  %v168_v42 = vmax.f32 %v160_v25, 0.0  ;;  %v170_v43 = vmax.f32 %v162_v31, 0.0  ;;  %v179_v57 = vpop.permute.xlu0 %178 }
  0x8e   :  { %v359_v50 = vpop.permute.xlu1 %358  ;;  %v1043_v61 = vunpack.c.l.s4 %v906_v60 }
  0x8f   :  { %v842_v44 = vpack.c.bf16 %v169_v40, %v165_v36  ;;  %v846_v45 = vpack.c.bf16 %v171_v41, %v167_v37  ;;  %v844_v46 = vpack.c.bf16 %v168_v42, %v164_v38  ;;  %v848_v47 = vpack.c.bf16 %v170_v43, %v166_v39 }
  0x90   :  { %v819_v11 = vunpack.c.0.s8 %v1043_v61 }
  0x91   :  { %843 = vmatprep.subr.bf16.mxu0 %v842_v44  ;;  %847 = vmatprep.subr.bf16.mxu1 %v846_v45 }
  0x92   :  { %845 = vmatpush1.bf16.msra.mxu0 %v844_v46  ;;  %849 = vmatpush1.bf16.msra.mxu1 %v848_v47  ;;  %v383_v40 = vpop.permute.xlu0 %382 }
  0x93   :  { %v1031_v51 = vpop.permute.xlu1 %410 }
  0x95   :  { %838 = vmatmul.mubr.msk.f32.vlgmr.msra.gmra.mrb[0].mxu0 %vm186_vm0, %v172_v48  ;;  %840 = vmatmul.mubr.msk.f32.vlgmr.msra.gmra.mrb[0].mxu1 %vm186_vm0, %v172_v48 }
  0x96   :  { %263 = vmatprep.mubr.f32.mxu0 %v891_v8  ;;  %340 = vmatprep.mubr.f32.mxu1 %v891_v8 }
  0x98   :  { %v1033_v52 = vpop.permute.xlu1 %438 }
  0x99   :  { %839 = vmatmul.mubr.msk.f32.gmra.mrb[2].mxu0 %vm186_vm0, %v173_v49  ;;  %841 = vmatmul.mubr.msk.f32.gmra.mrb[2].mxu1 %vm186_vm0, %v173_v49 }
  0x9d   :  { %v184_v53 = vpop.permute.xlu1 %183 }
  0xa2   :  { %v1035_v54 = vpop.permute.xlu1 %494 }
  0xa7   :  { %v1037_v55 = vpop.permute.xlu1 %550 }
  0xac   :  { %v1039_v56 = vpop.permute.xlu1 %578 }
  0xb1   :  { %v1041_v8 = vpop.permute.xlu1 %634 }
  0xb6   :  { %v1070_v22 = vpop.permute.xlu1 %662 }
 0x168   :  { %v259_v58 = vpop.f32.mrb[0].mxu0  ;;  %v336_v59 = vpop.f32.mrb[0].mxu1 }
 0x169   :  { %v260_v62 = vadd.f32 %v259_v58, %v179_v57  ;;  %v337_v63 = vadd.f32 %v336_v59, %v179_v57  ;;  %v261_v0 = vpop.f32.mrb[1].mxu0  ;;  %v338_v1 = vpop.f32.mrb[1].mxu1 }
 0x16a   :  { %v262_v2 = vadd.f32 %v261_v0, %v179_v57  ;;  %v339_v3 = vadd.f32 %v338_v1, %v179_v57  ;;  %v719_v58 = vpop.permute.xlu1 %718 }
 0x16b   :  { %v1045_v4 = vmax.f32 %v260_v62, 0.0  ;;  %v1047_v5 = vmax.f32 %v337_v63, 0.0 }
 0x16c   :  { %v1049_v6 = vmax.f32 %v262_v2, 0.0  ;;  %v1051_v7 = vmax.f32 %v339_v3, 0.0  ;;  %v265_v9 = vpop.f32.mrb[2].mxu0  ;;  %v342_v10 = vpop.f32.mrb[2].mxu1 }
 0x16d   :  { %v364_v12 = vrot.slane %v1045_v4, %v996_v32  ;;  %v388_v13 = vrot.slane %v1045_v4, %v981_v27  ;;  %v372_v14 = vrot.slane %v1047_v5, %v996_v32  ;;  %v396_v15 = vrot.slane %v1047_v5, %v981_v27  ;;  %v267_v16 = vpop.f32.mrb[3].mxu0  ;;  %v344_v17 = vpop.f32.mrb[3].mxu1 }
 0x16e   :  { %v368_v18 = vrot.slane %v1049_v6, %v996_v32  ;;  %v392_v19 = vrot.slane %v1049_v6, %v981_v27  ;;  %v376_v20 = vrot.slane %v1051_v7, %v996_v32  ;;  %v400_v21 = vrot.slane %v1051_v7, %v981_v27 }
 0x16f   :  { %v266_v23 = vadd.f32 %v265_v9, %v184_v53  ;;  %v343_v24 = vadd.f32 %v342_v10, %v184_v53  ;;  %v268_v25 = vadd.f32 %v267_v16, %v184_v53  ;;  %v345_v31 = vadd.f32 %v344_v17, %v184_v53 }
 0x170   :  { %v377_v36 = vmul.f32 %v364_v12, %v359_v50  ;;  %v378_v37 = vmul.f32 %v368_v18, %v359_v50  ;;  %v379_v38 = vmul.f32 %v372_v14, %v359_v50  ;;  %v380_v39 = vmul.f32 %v376_v20, %v359_v50 }
 0x171   :  { %v1072_v41 = vmax.f32 %v266_v23, 0.0  ;;  %v1074_v42 = vmax.f32 %v343_v24, 0.0  ;;  %v1076_v43 = vmax.f32 %v268_v25, 0.0  ;;  %v1078_v44 = vmax.f32 %v345_v31, 0.0 }
 0x172   :  { %v401_v45 = vmul.f32 %v388_v13, %v383_v40  ;;  %v402_v46 = vmul.f32 %v392_v19, %v383_v40  ;;  %v403_v47 = vmul.f32 %v396_v15, %v383_v40  ;;  %v404_v48 = vmul.f32 %v400_v21, %v383_v40 }
 0x173   :  { %v724_v49 = vrot.slane %v1072_v41, %v987_v29  ;;  %v728_v53 = vrot.slane %v1076_v43, %v987_v29  ;;  %v732_v50 = vrot.slane %v1074_v42, %v987_v29  ;;  %v736_v57 = vrot.slane %v1078_v44, %v987_v29 }
 0x174   :  { %v405_v59 = vadd.f32 %v401_v45, %v377_v36  ;;  %v406_v60 = vadd.f32 %v402_v46, %v378_v37  ;;  %v407_v62 = vadd.f32 %v403_v47, %v379_v38  ;;  %v408_v63 = vadd.f32 %v404_v48, %v380_v39  ;;  %v467_v47 = vpop.permute.xlu0 %466 }
 0x175   :  { %v1088_v0 = vmul.f32 %v724_v49, %v719_v58  ;;  %v1090_v1 = vmul.f32 %v728_v53, %v719_v58  ;;  %v1092_v2 = vmul.f32 %v732_v50, %v719_v58  ;;  %v1094_v3 = vmul.f32 %v736_v57, %v719_v58 }
 0x176   :  { %v416_v9 = vrot.slane %v1045_v4, %v999_v33  ;;  %v420_v10 = vrot.slane %v1049_v6, %v999_v33  ;;  %v424_v12 = vrot.slane %v1047_v5, %v999_v33  ;;  %v428_v13 = vrot.slane %v1051_v7, %v999_v33 }
 0x177   :  { %v444_v14 = vrot.slane %v1045_v4, %v984_v28  ;;  %v448_v15 = vrot.slane %v1049_v6, %v984_v28  ;;  %v452_v16 = vrot.slane %v1047_v5, %v984_v28  ;;  %v456_v17 = vrot.slane %v1051_v7, %v984_v28 }
 0x178   :  { %v429_v18 = vmul.f32 %v416_v9, %v1031_v51  ;;  %v430_v19 = vmul.f32 %v420_v10, %v1031_v51  ;;  %v431_v20 = vmul.f32 %v424_v12, %v1031_v51  ;;  %v432_v21 = vmul.f32 %v428_v13, %v1031_v51 }
 0x179   :  { %v457_v23 = vmul.f32 %v444_v14, %v1033_v52  ;;  %v458_v24 = vmul.f32 %v448_v15, %v1033_v52  ;;  %v459_v25 = vmul.f32 %v452_v16, %v1033_v52  ;;  %v460_v31 = vmul.f32 %v456_v17, %v1033_v52 }
 0x17a   :  { %v433_v36 = vadd.f32 %v429_v18, %v405_v59  ;;  %v434_v37 = vadd.f32 %v430_v19, %v406_v60  ;;  %v435_v38 = vadd.f32 %v431_v20, %v407_v62  ;;  %v436_v39 = vadd.f32 %v432_v21, %v408_v63 }
 0x17b   :  { %v472_v40 = vrot.slane %v1045_v4, %v1002_v34  ;;  %v476_v45 = vrot.slane %v1049_v6, %v1002_v34  ;;  %v480_v51 = vrot.slane %v1047_v5, %v1002_v34  ;;  %v484_v46 = vrot.slane %v1051_v7, %v1002_v34 }
 0x17c   :  { %v461_v48 = vadd.f32 %v457_v23, %v433_v36  ;;  %v462_v49 = vadd.f32 %v458_v24, %v434_v37  ;;  %v463_v52 = vadd.f32 %v459_v25, %v435_v38  ;;  %v464_v53 = vadd.f32 %v460_v31, %v436_v39  ;;  %v523_v23 = vpop.permute.xlu0 %522 }
 0x17d   :  { %v485_v50 = vmul.f32 %v472_v40, %v467_v47  ;;  %v486_v57 = vmul.f32 %v476_v45, %v467_v47  ;;  %v487_v58 = vmul.f32 %v480_v51, %v467_v47  ;;  %v488_v59 = vmul.f32 %v484_v46, %v467_v47 }
 0x17e   :  { %v500_v60 = vrot.slane %v1045_v4, %v987_v29  ;;  %v504_v62 = vrot.slane %v1049_v6, %v987_v29  ;;  %v508_v63 = vrot.slane %v1047_v5, %v987_v29  ;;  %v512_v9 = vrot.slane %v1051_v7, %v987_v29 }
 0x17f   :  { %v489_v10 = vadd.f32 %v485_v50, %v461_v48  ;;  %v490_v12 = vadd.f32 %v486_v57, %v462_v49  ;;  %v491_v13 = vadd.f32 %v487_v58, %v463_v52  ;;  %v492_v14 = vadd.f32 %v488_v59, %v464_v53 }
 0x180   :  { %v513_v15 = vmul.f32 %v500_v60, %v1035_v54  ;;  %v514_v16 = vmul.f32 %v504_v62, %v1035_v54  ;;  %v515_v17 = vmul.f32 %v508_v63, %v1035_v54  ;;  %v516_v18 = vmul.f32 %v512_v9, %v1035_v54 }
 0x181   :  { %v528_v19 = vrot.slane %v1045_v4, %v1005_v35  ;;  %v532_v20 = vrot.slane %v1049_v6, %v1005_v35  ;;  %v536_v29 = vrot.slane %v1047_v5, %v1005_v35  ;;  %v540_v21 = vrot.slane %v1051_v7, %v1005_v35 }
 0x182   :  { %v517_v24 = vadd.f32 %v513_v15, %v489_v10  ;;  %v518_v25 = vadd.f32 %v514_v16, %v490_v12  ;;  %v519_v31 = vadd.f32 %v515_v17, %v491_v13  ;;  %v520_v36 = vadd.f32 %v516_v18, %v492_v14  ;;  %v607_v16 = vpop.permute.xlu0 %606 }
 0x183   :  { %v541_v37 = vmul.f32 %v528_v19, %v523_v23  ;;  %v542_v38 = vmul.f32 %v532_v20, %v523_v23  ;;  %v543_v54 = vmul.f32 %v536_v29, %v523_v23  ;;  %v544_v39 = vmul.f32 %v540_v21, %v523_v23 }
 0x184   :  { %v556_v40 = vrot.slane %v1045_v4, %v990_v30  ;;  %v560_v45 = vrot.slane %v1049_v6, %v990_v30  ;;  %v564_v51 = vrot.slane %v1047_v5, %v990_v30  ;;  %v568_v46 = vrot.slane %v1051_v7, %v990_v30 }
 0x185   :  { %v545_v47 = vadd.f32 %v541_v37, %v517_v24  ;;  %v546_v48 = vadd.f32 %v542_v38, %v518_v25  ;;  %v547_v49 = vadd.f32 %v543_v54, %v519_v31  ;;  %v548_v52 = vadd.f32 %v544_v39, %v520_v36 }
 0x186   :  { %v569_v53 = vmul.f32 %v556_v40, %v1037_v55  ;;  %v570_v50 = vmul.f32 %v560_v45, %v1037_v55  ;;  %v571_v57 = vmul.f32 %v564_v51, %v1037_v55  ;;  %v572_v4 = vmul.f32 %v568_v46, %v1037_v55 }
 0x187   :  { %v584_v6 = vrot.slane %v1072_v41, %v996_v32  ;;  %v588_v5 = vrot.slane %v1076_v43, %v996_v32  ;;  %v592_v7 = vrot.slane %v1074_v42, %v996_v32  ;;  %v596_v58 = vrot.slane %v1078_v44, %v996_v32 }
 0x188   :  { %v573_v59 = vadd.f32 %v569_v53, %v545_v47  ;;  %v574_v60 = vadd.f32 %v570_v50, %v546_v48  ;;  %v575_v62 = vadd.f32 %v571_v57, %v547_v49  ;;  %v576_v63 = vadd.f32 %v572_v4, %v548_v52  ;;  %v691_v57 = vpop.permute.xlu0 %690 }
 0x189   :  { %v597_v9 = vmul.f32 %v584_v6, %v1039_v56  ;;  %v598_v55 = vmul.f32 %v588_v5, %v1039_v56  ;;  %v599_v10 = vmul.f32 %v592_v7, %v1039_v56  ;;  %v600_v12 = vmul.f32 %v596_v58, %v1039_v56 }
 0x18a   :  { %v612_v13 = vrot.slane %v1072_v41, %v981_v27  ;;  %v616_v14 = vrot.slane %v1076_v43, %v981_v27  ;;  %v620_v32 = vrot.slane %v1074_v42, %v981_v27  ;;  %v624_v15 = vrot.slane %v1078_v44, %v981_v27 }
 0x18b   :  { %v601_v17 = vadd.f32 %v597_v9, %v573_v59  ;;  %v602_v18 = vadd.f32 %v598_v55, %v574_v60  ;;  %v603_v19 = vadd.f32 %v599_v10, %v575_v62  ;;  %v604_v20 = vadd.f32 %v600_v12, %v576_v63 }
 0x18c   :  { %v625_v29 = vmul.f32 %v612_v13, %v607_v16  ;;  %v626_v21 = vmul.f32 %v616_v14, %v607_v16  ;;  %v627_v56 = vmul.f32 %v620_v32, %v607_v16  ;;  %v628_v23 = vmul.f32 %v624_v15, %v607_v16  ;;  %v747_v13 = vpop.permute.xlu1 %746 }
 0x18d   :  { %v640_v24 = vrot.slane %v1072_v41, %v999_v33  ;;  %v644_v25 = vrot.slane %v1076_v43, %v999_v33  ;;  %v648_v31 = vrot.slane %v1074_v42, %v999_v33  ;;  %v652_v27 = vrot.slane %v1078_v44, %v999_v33 }
 0x18e   :  { %v629_v36 = vadd.f32 %v625_v29, %v601_v17  ;;  %v630_v37 = vadd.f32 %v626_v21, %v602_v18  ;;  %v631_v38 = vadd.f32 %v627_v56, %v603_v19  ;;  %v632_v54 = vadd.f32 %v628_v23, %v604_v20  ;;  %v775_v23 = vpop.permute.xlu0 %774 }
 0x18f   :  { %v653_v39 = vmul.f32 %v640_v24, %v1041_v8  ;;  %v654_v40 = vmul.f32 %v644_v25, %v1041_v8  ;;  %v655_v45 = vmul.f32 %v648_v31, %v1041_v8  ;;  %v656_v51 = vmul.f32 %v652_v27, %v1041_v8 }
 0x190   :  { %v668_v46 = vrot.slane %v1072_v41, %v984_v28  ;;  %v672_v47 = vrot.slane %v1076_v43, %v984_v28  ;;  %v676_v33 = vrot.slane %v1074_v42, %v984_v28  ;;  %v680_v48 = vrot.slane %v1078_v44, %v984_v28 }
 0x191   :  { %v657_v49 = vadd.f32 %v653_v39, %v629_v36  ;;  %v658_v52 = vadd.f32 %v654_v40, %v630_v37  ;;  %v659_v53 = vadd.f32 %v655_v45, %v631_v38  ;;  %v660_v50 = vadd.f32 %v656_v51, %v632_v54 }
 0x192   :  { %v681_v4 = vmul.f32 %v668_v46, %v1070_v22  ;;  %v682_v8 = vmul.f32 %v672_v47, %v1070_v22  ;;  %v683_v6 = vmul.f32 %v676_v33, %v1070_v22  ;;  %v684_v5 = vmul.f32 %v680_v48, %v1070_v22 }
 0x193   :  { %v696_v7 = vrot.slane %v1072_v41, %v1002_v34  ;;  %v700_v58 = vrot.slane %v1076_v43, %v1002_v34  ;;  %v704_v28 = vrot.slane %v1074_v42, %v1002_v34  ;;  %v708_v59 = vrot.slane %v1078_v44, %v1002_v34 }
 0x194   :  { %v685_v60 = vadd.f32 %v681_v4, %v657_v49  ;;  %v686_v62 = vadd.f32 %v682_v8, %v658_v52  ;;  %v687_v63 = vadd.f32 %v683_v6, %v659_v53  ;;  %v688_v9 = vadd.f32 %v684_v5, %v660_v50 }
 0x195   :  { %v709_v55 = vmul.f32 %v696_v7, %v691_v57  ;;  %v710_v10 = vmul.f32 %v700_v58, %v691_v57  ;;  %v711_v12 = vmul.f32 %v704_v28, %v691_v57  ;;  %v712_v22 = vmul.f32 %v708_v59, %v691_v57 }
 0x196   :  { %v752_v14 = vrot.slane %v1072_v41, %v1005_v35  ;;  %v756_v32 = vrot.slane %v1076_v43, %v1005_v35  ;;  %v760_v15 = vrot.slane %v1074_v42, %v1005_v35  ;;  %v764_v34 = vrot.slane %v1078_v44, %v1005_v35 }
 0x197   :  { %v713_v16 = vadd.f32 %v709_v55, %v685_v60  ;;  %v714_v17 = vadd.f32 %v710_v10, %v686_v62  ;;  %v715_v18 = vadd.f32 %v711_v12, %v687_v63  ;;  %v716_v19 = vadd.f32 %v712_v22, %v688_v9 }
 0x198   :  { %v765_v20 = vmul.f32 %v752_v14, %v747_v13  ;;  %v766_v29 = vmul.f32 %v756_v32, %v747_v13  ;;  %v767_v21 = vmul.f32 %v760_v15, %v747_v13  ;;  %v768_v56 = vmul.f32 %v764_v34, %v747_v13 }
 0x199   :  { %v780_v24 = vrot.slane %v1072_v41, %v990_v30  ;;  %v784_v25 = vrot.slane %v1076_v43, %v990_v30  ;;  %v788_v31 = vrot.slane %v1074_v42, %v990_v30  ;;  %v792_v35 = vrot.slane %v1078_v44, %v990_v30  ;;  %v805_v42 = vpop.permute.xlu1 %804 }
 0x19a   :  { %v741_v27 = vadd.f32 %v1088_v0, %v713_v16  ;;  %v742_v36 = vadd.f32 %v1090_v1, %v714_v17  ;;  %v743_v37 = vadd.f32 %v1092_v2, %v715_v18  ;;  %v744_v38 = vadd.f32 %v1094_v3, %v716_v19 }
 0x19b   :  { %v793_v54 = vmul.f32 %v780_v24, %v775_v23  ;;  %v794_v39 = vmul.f32 %v784_v25, %v775_v23  ;;  %v795_v41 = vmul.f32 %v788_v31, %v775_v23  ;;  %v796_v40 = vmul.f32 %v792_v35, %v775_v23 }
 0x19c   :  { %v769_v45 = vadd.f32 %v765_v20, %v741_v27  ;;  %v770_v43 = vadd.f32 %v766_v29, %v742_v36  ;;  %v771_v51 = vadd.f32 %v767_v21, %v743_v37  ;;  %v772_v46 = vadd.f32 %v768_v56, %v744_v38 }
 0x19d   :  { %v822_v0 = vsub.s32 %v819_v11, %v978_v26 }
 0x19e   :  { %v797_v47 = vadd.f32 %v793_v54, %v769_v45  ;;  %v798_v33 = vadd.f32 %v794_v39, %v770_v43  ;;  %v799_v30 = vadd.f32 %v795_v41, %v771_v51  ;;  %v800_v44 = vadd.f32 %v796_v40, %v772_v46 }
 0x1a0   :  { %v807_v1 = vadd.f32 %v805_v42, %v797_v47  ;;  %v808_v2 = vadd.f32 %v805_v42, %v798_v33  ;;  %v809_v3 = vadd.f32 %v805_v42, %v799_v30  ;;  %v810_v48 = vadd.f32 %v805_v42, %v800_v44 }
 0x1a2   :  { %v815_v49 = vcombine.low %v807_v1, %v808_v2  ;;  %v816_v52 = vcombine.low %v809_v3, %v810_v48 }
 0x1a4   :  { %v823_v53 = vrot.slane %v815_v49, %v822_v0  ;;  %v830_v50 = vrot.slane %v816_v52, %v822_v0 }
 0x1a6   :  { %v831_v57 = vcombine.low %v823_v53, %v830_v50 }
 0x1a8   :  { %833 = vst [vmem:[%s1245_s7] sm:$0xff] %v831_v57 }

</bundles_post_ra>
